<compile_context>
chip_gen: v5e
topology: v5e:2x2
jax: 0.10.0
libtpu: 0.0.40
codegen_flags: <defaults>
</compile_context>

<pallas_src>
import functools
import math

import numpy as np
import jax
import jax.numpy as jnp
from jax.experimental import pallas as pl
from jax.experimental.pallas import tpu as pltpu


def _gaussian_1d(window_size: int, sigma: float) -> np.ndarray:
    g = np.array(
        [math.exp(-((x - window_size // 2) ** 2) / (2.0 * sigma ** 2))
         for x in range(window_size)],
        dtype=np.float64,
    )
    return (g / g.sum()).astype(np.float32)


def _conv_matrix(n: int, g: np.ndarray) -> np.ndarray:
    """Banded matrix M so that (x @ M)[j] = sum_k g[k] * x[j + k] ("valid" conv)."""
    ws = g.shape[0]
    n_out = n - ws + 1
    m = np.zeros((n, n_out), dtype=np.float32)
    for j in range(n_out):
        m[j:j + ws, j] = g
    return m


def _pick_planes_per_step(n_planes: int, H: int, W: int, window_size: int,
                          budget_bytes: int = 12 << 20) -> int:
    """Largest divisor of n_planes whose per-step working set fits the budget."""
    h_out = H - window_size + 1
    per_plane = 4 * (4 * H * W          # double-buffered x1/x2 input blocks
                     + 15 * H * W       # 5-slab + stage-1/2 temporaries
                     + 5 * h_out * H)   # resident broadcast Aht copies
    p_cap = max(1, budget_bytes // max(per_plane, 1))
    p_cap = int(min(p_cap, n_planes, 16))
    for p in range(p_cap, 0, -1):
        if n_planes % p == 0:
            return p
    return 1


def _ssim_loss_kernel(c_ref, x1_ref, x2_ref, aw_ref, ahtb_ref, out_ref):
    p, h, w = x1_ref.shape
    w_out = aw_ref.shape[-1]

    c1 = c_ref[0]                                  # SMEM scalars
    c2 = c_ref[1]

    x1 = x1_ref[...].astype(jnp.float32).reshape(p * h, w)
    x2 = x2_ref[...].astype(jnp.float32).reshape(p * h, w)

    # Five filter inputs stacked along the sublane axis: (5*p*h, w).
    slab = jnp.concatenate([x1, x2, x1 * x1, x2 * x2, x1 * x2], axis=0)

    # Stage 1: row (lane-axis) Gaussian filter — one big MXU matmul.
    t = jnp.dot(slab, aw_ref[...], preferred_element_type=jnp.float32)
    t = t.reshape(5 * p, h, w_out)                 # (5p, h, w_out)

    # Stage 2: column (sublane-axis) filter — one batched MXU matmul against
    # the resident broadcast band matrix (5p, h_out, h).
    y = jnp.einsum("boh,bhw->bow", ahtb_ref[...], t,
                   preferred_element_type=jnp.float32)   # (5p, h_out, w_out)

    mu1 = y[0 * p:1 * p]
    mu2 = y[1 * p:2 * p]
    e11 = y[2 * p:3 * p]
    e22 = y[3 * p:4 * p]
    e12 = y[4 * p:5 * p]

    mu1_sq = mu1 * mu1
    mu2_sq = mu2 * mu2
    mu1_mu2 = mu1 * mu2
    sigma1_sq = e11 - mu1_sq
    sigma2_sq = e22 - mu2_sq
    sigma12 = e12 - mu1_mu2

    v1 = 2.0 * sigma12 + c2
    v2 = sigma1_sq + sigma2_sq + c2
    num = (2.0 * mu1_mu2 + c1) * v1
    den = (mu1_sq + mu2_sq + c1) * v2
    ssim_map = num * pl.reciprocal(den, approx=True)      # (p, h_out, w_out)

    # Lane-dense partial-sum output block; final reduce/epilogue happens in JAX.
    total = jnp.sum(ssim_map)
    out_ref[...] = jnp.full((1, 8, 128), total, dtype=jnp.float32)


def ssim_loss(img1, img2, *, weight=1.0, window_size=11,
              size_average=True, val_range=None):
    """Pallas implementation of SSIM_Loss.forward. Returns a float32 scalar."""
    B, C, H, W = img1.shape
    assert img2.shape == (B, C, H, W)
    assert H >= window_size and W >= window_size
    # TODO(synk): only size_average=True (the module default) is implemented.
    assert size_average

    g = _gaussian_1d(window_size, 1.5)
    h_out = H - window_size + 1
    w_out = W - window_size + 1

    n_planes = B * C
    P = _pick_planes_per_step(n_planes, H, W, window_size)
    G = n_planes // P

    aw = jnp.asarray(_conv_matrix(W, g))                         # (W, w_out)
    aht = np.ascontiguousarray(_conv_matrix(H, g).T)             # (h_out, H)
    # Pre-broadcast Aht over the (5 quantities x P planes) batch so stage 2 is
    # a single batched matmul with no per-step in-kernel broadcast.
    aht_b = jnp.asarray(np.broadcast_to(aht[None], (5 * P, h_out, H)).copy())

    # Data-dependent dynamic range (matches the PyTorch val_range=None branch).
    # Jit the caller so XLA fuses max+min into one HBM pass over img1.
    if val_range is None:
        max_val = jnp.where(jnp.max(img1) > 128, 255.0, 1.0)
        min_val = jnp.where(jnp.min(img1) < -0.5, -1.0, 0.0)
        L = (max_val - min_val).astype(jnp.float32)
    else:
        L = jnp.float32(val_range)
    consts = jnp.stack([(0.01 * L) ** 2, (0.03 * L) ** 2]).astype(jnp.float32)

    # Flatten (B, C) -> plane axis; W stays on the 128-lane axis (free reshape).
    x1 = img1.reshape(n_planes, H, W)
    x2 = img2.reshape(n_planes, H, W)

    est = 4 * (4 * P * H * W                 # double-buffered x1/x2 blocks
               + 15 * P * H * W              # slab + matmul temporaries
               + 5 * P * h_out * H           # resident Aht broadcast
               + W * w_out                   # resident Aw
               + 10 * P * h_out * w_out      # elementwise temporaries
               + 2 * 8 * 128)                # double-buffered output block
    vmem_limit = int(min(max(32 << 20, 2 * est), 56 << 20))

    partials = pl.pallas_call(
        _ssim_loss_kernel,
        out_shape=jax.ShapeDtypeStruct((G, 8, 128), jnp.float32),
        grid_spec=pltpu.PrefetchScalarGridSpec(
            num_scalar_prefetch=0,
            grid=(G,),
            in_specs=[
                pl.BlockSpec(memory_space=pltpu.MemorySpace.SMEM),       # [C1, C2]
                pl.BlockSpec((P, H, W), lambda i: (i, 0, 0)),            # img1 planes
                pl.BlockSpec((P, H, W), lambda i: (i, 0, 0)),            # img2 planes
                pl.BlockSpec((W, w_out), lambda i: (0, 0)),              # Aw (resident)
                pl.BlockSpec((5 * P, h_out, H), lambda i: (0, 0, 0)),    # Aht bcast (resident)
            ],
            out_specs=pl.BlockSpec((1, 8, 128), lambda i: (i, 0, 0)),    # per-step partial
        ),
        compiler_params=pltpu.CompilerParams(
            dimension_semantics=("parallel",),     # independent partial sums
            vmem_limit_bytes=vmem_limit,
        ),
    )(consts, x1, x2, aw, aht_b)

    n_total = n_planes * h_out * w_out
    mean_ssim = jnp.sum(partials[:, 0, 0]) / jnp.float32(n_total)
    return (jnp.float32(weight) * (1.0 - mean_ssim)).astype(jnp.float32)


def _ssim_loss_ref(img1, img2, *, weight, window_size, val_range):
    """Pure-JAX reference mirroring the PyTorch SSIM_Loss.forward exactly."""
    B, C, H, W = img1.shape
    g = jnp.asarray(_gaussian_1d(window_size, 1.5))
    w2d = jnp.outer(g, g)
    window = jnp.broadcast_to(w2d[None, None], (C, 1, window_size, window_size))

    if val_range is None:
        max_val = jnp.where(jnp.max(img1) > 128, 255.0, 1.0)
        min_val = jnp.where(jnp.min(img1) < -0.5, -1.0, 0.0)
        L = max_val - min_val
    else:
        L = jnp.float32(val_range)

    def dconv(x):
        return jax.lax.conv_general_dilated(
            x, window, window_strides=(1, 1), padding="VALID",
            dimension_numbers=("NCHW", "OIHW", "NCHW"),
            feature_group_count=C)

    mu1 = dconv(img1)
    mu2 = dconv(img2)
    mu1_sq = mu1 * mu1
    mu2_sq = mu2 * mu2
    mu1_mu2 = mu1 * mu2
    sigma1_sq = dconv(img1 * img1) - mu1_sq
    sigma2_sq = dconv(img2 * img2) - mu2_sq
    sigma12 = dconv(img1 * img2) - mu1_mu2

    C1 = (0.01 * L) ** 2
    C2 = (0.03 * L) ** 2
    v1 = 2.0 * sigma12 + C2
    v2 = sigma1_sq + sigma2_sq + C2
    ssim_map = (2 * mu1_mu2 + C1) * v1 / ((mu1_sq + mu2_sq + C1) * v2)
    return weight * (1.0 - jnp.mean(ssim_map))


if __name__ == "__main__":
    key = jax.random.PRNGKey(0)
    k1, k2 = jax.random.split(key, 2)

    B, C, H, W = 2, 4, 16, 16
    weight = 0.7

    img1 = jax.random.uniform(k1, (B, C, H, W), dtype=jnp.float32)
    noise = 0.05 * jax.random.normal(k2, (B, C, H, W), dtype=jnp.float32)
    img2 = jnp.clip(img1 + noise, 0.0, 1.0)

    loss_fn = jax.jit(functools.partial(
        ssim_loss, weight=weight, window_size=11,
        size_average=True, val_range=None))
    loss = jax.block_until_ready(loss_fn(img1, img2))

    ref = _ssim_loss_ref(img1, img2, weight=weight, window_size=11,
                         val_range=None)
    assert jnp.allclose(loss, ref, rtol=2e-3, atol=2e-3), (loss, ref)

    print("KERNEL_OK")
</pallas_src>

<mosaic_0001>
module attributes {stable_mosaic.version = 11 : i64} {
  func.func @_ssim_loss_kernel(%arg0: i32, %arg1: memref<2xf32, #tpu.memory_space<smem>>, %arg2: memref<8x16x16xf32, #tpu.memory_space<vmem>>, %arg3: memref<8x16x16xf32, #tpu.memory_space<vmem>>, %arg4: memref<16x6xf32, #tpu.memory_space<vmem>>, %arg5: memref<40x6x16xf32, #tpu.memory_space<vmem>>, %arg6: memref<1x8x128xf32, #tpu.memory_space<vmem>>) attributes {dimension_semantics = [#tpu.dimension_semantics<parallel>], iteration_bounds = array<i64: 1>, scalar_prefetch = 0 : i64, scratch_operands = 0 : i64, tpu.core_type = #tpu.core_type<tc>, window_params = [{transform_indices = @transform_0, window_bounds = array<i64: 2>}, {transform_indices = @transform_1, window_bounds = array<i64: 8, 16, 16>}, {transform_indices = @transform_2, window_bounds = array<i64: 8, 16, 16>}, {pipeline_mode = #tpu.pipeline_mode<synchronous>, transform_indices = @transform_3, window_bounds = array<i64: 16, 6>}, {pipeline_mode = #tpu.pipeline_mode<synchronous>, transform_indices = @transform_4, window_bounds = array<i64: 40, 6, 16>}, {transform_indices = @transform_5, window_bounds = array<i64: 1, 8, 128>}]} {
    %c0 = arith.constant 0 : index
    %0 = memref.load %arg1[%c0] : memref<2xf32, #tpu.memory_space<smem>>
    %c1 = arith.constant 1 : index
    %1 = memref.load %arg1[%c1] : memref<2xf32, #tpu.memory_space<smem>>
    %c0_0 = arith.constant 0 : index
    %c0_1 = arith.constant 0 : index
    %c0_2 = arith.constant 0 : index
    %2 = vector.load %arg2[%c0_0, %c0_1, %c0_2] : memref<8x16x16xf32, #tpu.memory_space<vmem>>, vector<8x16x16xf32>
    %3 = vector.shape_cast %2 : vector<8x16x16xf32> to vector<128x16xf32>
    %c0_3 = arith.constant 0 : index
    %c0_4 = arith.constant 0 : index
    %c0_5 = arith.constant 0 : index
    %4 = vector.load %arg3[%c0_3, %c0_4, %c0_5] : memref<8x16x16xf32, #tpu.memory_space<vmem>>, vector<8x16x16xf32>
    %5 = vector.shape_cast %4 : vector<8x16x16xf32> to vector<128x16xf32>
    %6 = arith.mulf %3, %3 : vector<128x16xf32>
    %7 = arith.mulf %5, %5 : vector<128x16xf32>
    %8 = arith.mulf %3, %5 : vector<128x16xf32>
    %9 = tpu.concatenate %3, %5, %6, %7, %8 in 0 : vector<128x16xf32>, vector<128x16xf32>, vector<128x16xf32>, vector<128x16xf32>, vector<128x16xf32> -> vector<640x16xf32>
    %c0_6 = arith.constant 0 : index
    %c0_7 = arith.constant 0 : index
    %10 = vector.load %arg4[%c0_6, %c0_7] : memref<16x6xf32, #tpu.memory_space<vmem>>, vector<16x6xf32>
    %cst = arith.constant dense<0.000000e+00> : vector<640x6xf32>
    %11 = tpu.matmul %9, %10, %cst {dimension_numbers = #tpu.dot_dimension_numbers<[1], [0], [0], [1], [0, 0, 1, 1], [], []>} : vector<640x16xf32>, vector<16x6xf32>, vector<640x6xf32> -> vector<640x6xf32>
    %12 = vector.shape_cast %11 : vector<640x6xf32> to vector<40x16x6xf32>
    %c0_8 = arith.constant 0 : index
    %c0_9 = arith.constant 0 : index
    %c0_10 = arith.constant 0 : index
    %13 = vector.load %arg5[%c0_8, %c0_9, %c0_10] : memref<40x6x16xf32, #tpu.memory_space<vmem>>, vector<40x6x16xf32>
    "tpu.trace_start"() <{level = 10 : i32, message = "boh,bhw->bow"}> : () -> ()
    %cst_11 = arith.constant dense<0.000000e+00> : vector<40x6x6xf32>
    %14 = tpu.matmul %13, %12, %cst_11 {dimension_numbers = #tpu.dot_dimension_numbers<[2], [1], [1], [2], [0, 0, 0, 1, 1, 2], [0], [0]>} : vector<40x6x16xf32>, vector<40x16x6xf32>, vector<40x6x6xf32> -> vector<40x6x6xf32>
    "tpu.trace_stop"() : () -> ()
    %15 = vector.extract_strided_slice %14 {offsets = [0, 0, 0], sizes = [8, 6, 6], strides = [1, 1, 1]} : vector<40x6x6xf32> to vector<8x6x6xf32>
    %16 = vector.extract_strided_slice %14 {offsets = [8, 0, 0], sizes = [8, 6, 6], strides = [1, 1, 1]} : vector<40x6x6xf32> to vector<8x6x6xf32>
    %17 = vector.extract_strided_slice %14 {offsets = [16, 0, 0], sizes = [8, 6, 6], strides = [1, 1, 1]} : vector<40x6x6xf32> to vector<8x6x6xf32>
    %18 = vector.extract_strided_slice %14 {offsets = [24, 0, 0], sizes = [8, 6, 6], strides = [1, 1, 1]} : vector<40x6x6xf32> to vector<8x6x6xf32>
    %19 = vector.extract_strided_slice %14 {offsets = [32, 0, 0], sizes = [8, 6, 6], strides = [1, 1, 1]} : vector<40x6x6xf32> to vector<8x6x6xf32>
    %20 = arith.mulf %15, %15 : vector<8x6x6xf32>
    %21 = arith.mulf %16, %16 : vector<8x6x6xf32>
    %22 = arith.mulf %15, %16 : vector<8x6x6xf32>
    %23 = arith.subf %17, %20 : vector<8x6x6xf32>
    %24 = arith.subf %18, %21 : vector<8x6x6xf32>
    %25 = arith.subf %19, %22 : vector<8x6x6xf32>
    %cst_12 = arith.constant 2.000000e+00 : f32
    %26 = vector.broadcast %cst_12 : f32 to vector<8x6x6xf32>
    %27 = arith.mulf %26, %25 : vector<8x6x6xf32>
    %28 = vector.broadcast %1 : f32 to vector<8x6x6xf32>
    %29 = arith.addf %27, %28 : vector<8x6x6xf32>
    %30 = arith.addf %23, %24 : vector<8x6x6xf32>
    %31 = vector.broadcast %1 : f32 to vector<8x6x6xf32>
    %32 = arith.addf %30, %31 : vector<8x6x6xf32>
    %cst_13 = arith.constant 2.000000e+00 : f32
    %33 = vector.broadcast %cst_13 : f32 to vector<8x6x6xf32>
    %34 = arith.mulf %33, %22 : vector<8x6x6xf32>
    %35 = vector.broadcast %0 : f32 to vector<8x6x6xf32>
    %36 = arith.addf %34, %35 : vector<8x6x6xf32>
    %37 = arith.mulf %36, %29 : vector<8x6x6xf32>
    %38 = arith.addf %20, %21 : vector<8x6x6xf32>
    %39 = vector.broadcast %0 : f32 to vector<8x6x6xf32>
    %40 = arith.addf %38, %39 : vector<8x6x6xf32>
    %41 = arith.mulf %40, %32 : vector<8x6x6xf32>
    %42 = tpu.reciprocal %41 {approx = true} : vector<8x6x6xf32> -> vector<8x6x6xf32>
    %43 = arith.mulf %37, %42 : vector<8x6x6xf32>
    %44 = vector.shape_cast %43 : vector<8x6x6xf32> to vector<1x8x6x6xf32>
    %cst_14 = arith.constant dense<0.000000e+00> : vector<1xf32>
    %45 = vector.multi_reduction <add>, %44, %cst_14 [1, 2, 3] : vector<1x8x6x6xf32> to vector<1xf32>
    %46 = vector.shape_cast %45 : vector<1xf32> to vector<1x1x1x1xf32>
    %47 = vector.extract %46[0, 0, 0, 0] : f32 from vector<1x1x1x1xf32>
    %48 = vector.broadcast %47 : f32 to vector<1x8x128xf32>
    %c0_15 = arith.constant 0 : index
    %c0_16 = arith.constant 0 : index
    %c0_17 = arith.constant 0 : index
    %49 = vector.load %arg6[%c0_15, %c0_16, %c0_17] : memref<1x8x128xf32, #tpu.memory_space<vmem>>, vector<1x8x128xf32>
    tpu.vector_store %arg6[%c0_15, %c0_16, %c0_17], %48 {strides = array<i32>} : memref<1x8x128xf32, #tpu.memory_space<vmem>>, vector<1x8x128xf32>,
    return
  }
  func.func @transform_0(%arg0: i32) -> i32 {
    %c0_i32 = arith.constant 0 : i32
    %c0_i32_0 = arith.constant 0 : i32
    return %c0_i32 : i32
  }
  func.func @transform_1(%arg0: i32) -> (i32, i32, i32) {
    %c0_i32 = arith.constant 0 : i32
    %c0_i32_0 = arith.constant 0 : i32
    %c0_i32_1 = arith.constant 0 : i32
    return %arg0, %c0_i32, %c0_i32_0 : i32, i32, i32
  }
  func.func @transform_2(%arg0: i32) -> (i32, i32, i32) {
    %c0_i32 = arith.constant 0 : i32
    %c0_i32_0 = arith.constant 0 : i32
    %c0_i32_1 = arith.constant 0 : i32
    return %arg0, %c0_i32, %c0_i32_0 : i32, i32, i32
  }
  func.func @transform_3(%arg0: i32) -> (i32, i32) {
    %c0_i32 = arith.constant 0 : i32
    %c0_i32_0 = arith.constant 0 : i32
    %c0_i32_1 = arith.constant 0 : i32
    return %c0_i32, %c0_i32_0 : i32, i32
  }
  func.func @transform_4(%arg0: i32) -> (i32, i32, i32) {
    %c0_i32 = arith.constant 0 : i32
    %c0_i32_0 = arith.constant 0 : i32
    %c0_i32_1 = arith.constant 0 : i32
    %c0_i32_2 = arith.constant 0 : i32
    return %c0_i32, %c0_i32_0, %c0_i32_1 : i32, i32, i32
  }
  func.func @transform_5(%arg0: i32) -> (i32, i32, i32) {
    %c0_i32 = arith.constant 0 : i32
    %c0_i32_0 = arith.constant 0 : i32
    %c0_i32_1 = arith.constant 0 : i32
    return %arg0, %c0_i32, %c0_i32_0 : i32, i32, i32
  }
}

</mosaic_0001>

<bundles_post_ra>
// kernel: ssim_loss.1
= control target key start
LH: loop header
LB: loop body
LE: loop exit
PB: predicated region body
PF: predicated region fallthrough
CT: control target
= control target key end

     0   :  { %10 = vsyncpa [#allocation4], 0  ;;  %s2570_s0 = inlined_call_operand.vmem [shape: f32[2], index: 0, kind: input, shape index: {}]   ;;  %s2571_s1 = inlined_call_operand.vmem [shape: f32[8,16,16], index: 1, kind: input, shape index: {}]   ;;  %s2572_s2 = inlined_call_operand.hbm [shape: f32[8,16,16], index: 2, kind: input, shape index: {}]   ;;  %s2573_s3 = inlined_call_operand.vmem [shape: f32[16,6], index: 3, kind: input, shape index: {}]   ;;  %s2574_s4 = inlined_call_operand.hbm [shape: f32[40,6,16], index: 4, kind: input, shape index: {}]   ;;  %s2575_s5 = inlined_call_operand.vmem [shape: f32[1,8,128], index: 5, kind: output, shape index: {}]  }
   0x1   :  { %11 = vsyncpa [#allocation3], 0  ;;  %s18_s20 = sshll.u32 %s2570_s0, 4  ;;  %s19_s20 = int_to_ptr.vmem [resolvable:$true] %s18_s20 }
   0x2   :  { %12 = vsyncpa [#allocation7], 0  ;;  %s28_s23 = sshll.u32 %s2572_s2, 4  ;;  %s2003_s24 = smov [#allocation2]   ;;  %s29_s23 = int_to_ptr.hbm [resolvable:$true] %s28_s23 }
   0x3   :  { %21 = dma.vmem_to_smem %s19_s20, 16, %s2003_s24, [#allocation4]  }
   0x4   :  { %s2004_s25 = smov [#allocation5]   ;;  %s2005_s27 = smov 128  }
   0x5   :  { %s30_s26 = sshll.u32 %s2004_s25, 4  ;;  %s2006_s28 = smov 8   ;;  %s31_s26 = int_to_ptr.vmem [resolvable:$true] %s30_s26 }
   0x6   :  { %36 = dma.hbm_to_vmem [thread:$0]  %s29_s23, 2048, %s31_s26, [#allocation3], %s2005_s27, %s2005_s27, %s2006_s28  }
   0x7   :  { %s43_s6 = sshll.u32 %s2574_s4, 4  ;;  %s2007_s0 = smov [#allocation6]   ;;  %s44_s6 = int_to_ptr.hbm [resolvable:$true] %s43_s6 }
   0x8   :  { %s45_s7 = sshll.u32 %s2007_s0, 4  ;;  %s46_s7 = int_to_ptr.vmem [resolvable:$true] %s45_s7 }
   0x9   :  { %51 = dma.hbm_to_vmem [thread:$0]  %s44_s6, 5120, %s46_s7, [#allocation7], %s2005_s27, %s2005_s27, %s2006_s28  }
   0xa   :  { %1997 = dma.done.wait [#allocation4], 16  }
   0xb   :  { %1998 = vsyncadd [#allocation4], 4294967280 }
   0xc   :  { %1999 = dma.done.wait [#allocation3], 2048  }
   0xd   :  { %2000 = vsyncadd [#allocation3], 4294965248 }
   0xe   :  { %2001 = dma.done.wait [#allocation7], 5120  }
   0xf   :  { %2002 = vsyncadd [#allocation7], 4294962176 }
  0x10   :  { %64 = sfence }
  0x11   :  { %v148_v0 = vld [vmem:[%s2573_s3 + $0x8] sm:$0xff]  ;;  %v147_v1 = vld [vmem:[%s2573_s3] sm:$0xff]  ;;  %vm149_vm0 = vcmask 130048   ;;  %v69_v4 = vld [vmem:[%s2571_s1 + $0x10] sm:$0xff]  ;;  %s1787_s13 = sld [smem:[#allocation2 + $0x1]]  ;;  %vm1753_vm1 = vcmask 46080  }
  0x12   :  { %404 = vmatpush.msra.mxu0 %v148_v0  ;;  %v67_v2 = vld [vmem:[%s2571_s1] sm:$0xff]  ;;  %1908 = vmatpush.msra.mxu1 %v148_v0  ;;  %v68_v3 = vld [vmem:[%s2571_s1 + $0x8] sm:$0xff]  ;;  %v2068_v5 = vld [vmem:[%s2571_s1 + $0x18] sm:$0xff]  ;;  %v101_v27 = vmul.f32 %v69_v4, %v69_v4 }
  0x13   :  { %1909 = vmatpush.msra.mxu2 %v148_v0  ;;  %1910 = vmatpush.msra.mxu3 %v148_v0  ;;  %v2075_v6 = vld [vmem:[%s2571_s1 + $0x20] sm:$0xff]  ;;  %v2082_v7 = vld [vmem:[%s2571_s1 + $0x28] sm:$0xff]  ;;  %v2089_v8 = vld [vmem:[%s2571_s1 + $0x30] sm:$0xff]  ;;  %v99_v17 = vmul.f32 %v67_v2, %v67_v2  ;;  %v100_v22 = vmul.f32 %v68_v3, %v68_v3  ;;  %v102_v32 = vmul.f32 %v2068_v5, %v2068_v5 }
  0x14   :  { %405 = vmatpush.msra.mxu0 %v147_v1  ;;  %1911 = vmatpush.msra.mxu1 %v147_v1  ;;  %v2096_v9 = vld [vmem:[%s2571_s1 + $0x38] sm:$0xff]  ;;  %v2103_v10 = vld [vmem:[%s2571_s1 + $0x40] sm:$0xff]  ;;  %v2107_v11 = vld [vmem:[#allocation5 + $0x70] sm:$0xff]  ;;  %v103_v36 = vmul.f32 %v2075_v6, %v2075_v6  ;;  %v104_v40 = vmul.f32 %v2082_v7, %v2082_v7  ;;  %v105_v45 = vmul.f32 %v2089_v8, %v2089_v8 }
  0x15   :  { %1788 = vmatmul.msk.f32.vlgmr.msra.gmra.mxu0 %vm149_vm0, %v67_v2  ;;  %1912 = vmatpush.msra.mxu2 %v147_v1  ;;  %v2114_v12 = vld [vmem:[%s2571_s1 + $0x48] sm:$0xff]  ;;  %v2118_v13 = vld [vmem:[#allocation5 + $0x78] sm:$0xff]  ;;  %v2123_v14 = vld [vmem:[%s2571_s1 + $0x70] sm:$0xff]  ;;  %v106_v50 = vmul.f32 %v2096_v9, %v2096_v9  ;;  %v107_v55 = vmul.f32 %v2103_v10, %v2103_v10 }
  0x16   :  { %1913 = vmatpush.msra.mxu3 %v147_v1  ;;  %1818 = vmatmul.msk.f32.vlgmr.msra.gmra.mxu1 %vm149_vm0, %v2107_v11  ;;  %v113_v15 = vmul.f32 %v2123_v14, %v2123_v14  ;;  %v2133_v16 = vld [vmem:[%s2571_s1 + $0x50] sm:$0xff]  ;;  %v2140_v18 = vld [vmem:[%s2571_s1 + $0x78] sm:$0xff]  ;;  %v83_v21 = vld [vmem:[#allocation5] sm:$0xff]  ;;  %v130_v24 = vmul.f32 %v2118_v13, %v2118_v13  ;;  %v108_v60 = vmul.f32 %v2114_v12, %v2114_v12 }
  0x17   :  { %v114_v19 = vmul.f32 %v2140_v18, %v2140_v18  ;;  %v2149_v20 = vld [vmem:[%s2571_s1 + $0x58] sm:$0xff]  ;;  %v115_v23 = vmul.f32 %v83_v21, %v83_v21  ;;  %v2158_v25 = vld [vmem:[%s2571_s1 + $0x60] sm:$0xff]  ;;  %v84_v26 = vld [vmem:[#allocation5 + $0x8] sm:$0xff]  ;;  %v131_v29 = vmul.f32 %v83_v21, %v67_v2  ;;  %v109_v1 = vmul.f32 %v2133_v16, %v2133_v16 }
  0x18   :  { %1834 = vmatmul.msk.f32.vlgmr.msra.gmra.mxu2 %vm149_vm0, %v113_v15  ;;  %1851 = vmatmul.msk.f32.vlgmr.msra.gmra.mxu3 %vm149_vm0, %v130_v24  ;;  %v116_v28 = vmul.f32 %v84_v26, %v84_v26  ;;  %v2168_v30 = vld [vmem:[%s2571_s1 + $0x68] sm:$0xff]  ;;  %v85_v31 = vld [vmem:[#allocation5 + $0x10] sm:$0xff]  ;;  %v132_v34 = vmul.f32 %v84_v26, %v68_v3  ;;  %v86_v35 = vld [vmem:[#allocation5 + $0x18] sm:$0xff]  ;;  %v111_v15 = vmul.f32 %v2158_v25, %v2158_v25  ;;  %s65_s1 = sld [smem:[#allocation2]] }
  0x19   :  { %v117_v33 = vmul.f32 %v85_v31, %v85_v31  ;;  %v118_v37 = vmul.f32 %v86_v35, %v86_v35  ;;  %v133_v38 = vmul.f32 %v85_v31, %v69_v4  ;;  %v87_v39 = vld [vmem:[#allocation5 + $0x20] sm:$0xff]  ;;  %v134_v42 = vmul.f32 %v86_v35, %v2068_v5  ;;  %v88_v44 = vld [vmem:[#allocation5 + $0x28] sm:$0xff]  ;;  %v89_v49 = vld [vmem:[#allocation5 + $0x30] sm:$0xff] }
  0x1a   :  { %v119_v41 = vmul.f32 %v87_v39, %v87_v39  ;;  %v120_v46 = vmul.f32 %v88_v44, %v88_v44  ;;  %v135_v47 = vmul.f32 %v87_v39, %v2075_v6  ;;  %v121_v51 = vmul.f32 %v89_v49, %v89_v49  ;;  %v90_v54 = vld [vmem:[#allocation5 + $0x38] sm:$0xff]  ;;  %v91_v59 = vld [vmem:[#allocation5 + $0x40] sm:$0xff]  ;;  %v92_v0 = vld [vmem:[#allocation5 + $0x48] sm:$0xff] }
  0x1b   :  { %v136_v52 = vmul.f32 %v88_v44, %v2082_v7  ;;  %v122_v56 = vmul.f32 %v90_v54, %v90_v54  ;;  %v137_v58 = vmul.f32 %v89_v49, %v2089_v8  ;;  %v123_v61 = vmul.f32 %v91_v59, %v91_v59 }
  0x1c   :  { %v138_v63 = vmul.f32 %v90_v54, %v2096_v9  ;;  %v124_v2 = vmul.f32 %v92_v0, %v92_v0 }
  0x1d   :  { %1789 = vmatmul.msk.f32.gmra.mxu0 %vm149_vm0, %v68_v3 }
  0x1e   :  { %1819 = vmatmul.msk.f32.gmra.mxu1 %vm149_vm0, %v2118_v13 }
  0x20   :  { %1835 = vmatmul.msk.f32.gmra.mxu2 %vm149_vm0, %v114_v19  ;;  %1852 = vmatmul.msk.f32.gmra.mxu3 %vm149_vm0, %v131_v29 }
  0x25   :  { %1790 = vmatmul.msk.f32.gmra.mxu0 %vm149_vm0, %v69_v4  ;;  %v139_v4 = vmul.f32 %v91_v59, %v2103_v10 }
  0x26   :  { %1820 = vmatmul.msk.f32.gmra.mxu1 %vm149_vm0, %v99_v17 }
  0x28   :  { %1836 = vmatmul.msk.f32.gmra.mxu2 %vm149_vm0, %v115_v23  ;;  %1853 = vmatmul.msk.f32.gmra.mxu3 %vm149_vm0, %v132_v34 }
  0x2d   :  { %1791 = vmatmul.msk.f32.gmra.mxu0 %vm149_vm0, %v2068_v5  ;;  %v93_v5 = vld [vmem:[#allocation5 + $0x50] sm:$0xff] }
  0x2e   :  { %1821 = vmatmul.msk.f32.gmra.mxu1 %vm149_vm0, %v100_v22  ;;  %v112_v22 = vmul.f32 %v2168_v30, %v2168_v30 }
  0x30   :  { %1837 = vmatmul.msk.f32.gmra.mxu2 %vm149_vm0, %v116_v28  ;;  %1854 = vmatmul.msk.f32.gmra.mxu3 %vm149_vm0, %v133_v38 }
  0x35   :  { %1792 = vmatmul.msk.f32.gmra.mxu0 %vm149_vm0, %v2075_v6  ;;  %v110_v6 = vmul.f32 %v2149_v20, %v2149_v20 }
  0x36   :  { %1822 = vmatmul.msk.f32.gmra.mxu1 %vm149_vm0, %v101_v27 }
  0x38   :  { %1838 = vmatmul.msk.f32.gmra.mxu2 %vm149_vm0, %v117_v33  ;;  %1855 = vmatmul.msk.f32.gmra.mxu3 %vm149_vm0, %v134_v42  ;;  %v649_v42 = vld [vmem:[#allocation6 + $0x10] sm:$0x3f] }
  0x3d   :  { %1793 = vmatmul.msk.f32.gmra.mxu0 %vm149_vm0, %v2082_v7  ;;  %v125_v7 = vmul.f32 %v93_v5, %v93_v5 }
  0x3e   :  { %1823 = vmatmul.msk.f32.gmra.mxu1 %vm149_vm0, %v102_v32 }
  0x40   :  { %1839 = vmatmul.msk.f32.gmra.mxu2 %vm149_vm0, %v118_v37  ;;  %1856 = vmatmul.msk.f32.gmra.mxu3 %vm149_vm0, %v135_v47  ;;  %v648_v37 = vld [vmem:[#allocation6 + $0x8] sm:$0x3f]  ;;  %v650_v47 = vld [vmem:[#allocation6 + $0x18] sm:$0x3f] }
  0x45   :  { %1794 = vmatmul.msk.f32.gmra.mxu0 %vm149_vm0, %v2089_v8 }
  0x46   :  { %1824 = vmatmul.msk.f32.gmra.mxu1 %vm149_vm0, %v103_v36  ;;  %v145_v36 = vmul.f32 %v2107_v11, %v2123_v14 }
  0x48   :  { %1840 = vmatmul.msk.f32.gmra.mxu2 %vm149_vm0, %v119_v41  ;;  %1857 = vmatmul.msk.f32.gmra.mxu3 %vm149_vm0, %v136_v52 }
  0x4d   :  { %1795 = vmatmul.msk.f32.gmra.mxu0 %vm149_vm0, %v2096_v9  ;;  %v140_v9 = vmul.f32 %v92_v0, %v2114_v12 }
  0x4e   :  { %1825 = vmatmul.msk.f32.gmra.mxu1 %vm149_vm0, %v104_v40  ;;  %v146_v40 = vmul.f32 %v2118_v13, %v2140_v18 }
  0x50   :  { %1841 = vmatmul.msk.f32.gmra.mxu2 %vm149_vm0, %v120_v46  ;;  %1858 = vmatmul.msk.f32.gmra.mxu3 %vm149_vm0, %v137_v58 }
  0x55   :  { %1796 = vmatmul.msk.f32.gmra.mxu0 %vm149_vm0, %v2103_v10  ;;  %v94_v10 = vld [vmem:[#allocation5 + $0x58] sm:$0xff] }
  0x56   :  { %1826 = vmatmul.msk.f32.gmra.mxu1 %vm149_vm0, %v105_v45  ;;  %v126_v17 = vmul.f32 %v94_v10, %v94_v10 }
  0x58   :  { %1842 = vmatmul.msk.f32.gmra.mxu2 %vm149_vm0, %v121_v51  ;;  %1859 = vmatmul.msk.f32.gmra.mxu3 %vm149_vm0, %v138_v63  ;;  %v652_v63 = vld [vmem:[#allocation6 + $0x28] sm:$0x3f] }
  0x5d   :  { %1797 = vmatmul.msk.f32.gmra.mxu0 %vm149_vm0, %v2114_v12  ;;  %v95_v12 = vld [vmem:[#allocation5 + $0x60] sm:$0xff] }
  0x5e   :  { %1827 = vmatmul.msk.f32.gmra.mxu1 %vm149_vm0, %v106_v50  ;;  %v127_v23 = vmul.f32 %v95_v12, %v95_v12  ;;  %v143_v29 = vmul.f32 %v95_v12, %v2158_v25 }
  0x60   :  { %1843 = vmatmul.msk.f32.gmra.mxu2 %vm149_vm0, %v122_v56  ;;  %1860 = vmatmul.msk.f32.gmra.mxu3 %vm149_vm0, %v139_v4  ;;  %v651_v56 = vld [vmem:[#allocation6 + $0x20] sm:$0x3f] }
  0x65   :  { %1798 = vmatmul.msk.f32.gmra.mxu0 %vm149_vm0, %v2133_v16 }
  0x66   :  { %1828 = vmatmul.msk.f32.gmra.mxu1 %vm149_vm0, %v107_v55 }
  0x68   :  { %1844 = vmatmul.msk.f32.gmra.mxu2 %vm149_vm0, %v123_v61  ;;  %1861 = vmatmul.msk.f32.gmra.mxu3 %vm149_vm0, %v140_v9  ;;  %v655_v9 = vld [vmem:[#allocation6 + $0x40] sm:$0x3f] }
  0x6d   :  { %1799 = vmatmul.msk.f32.gmra.mxu0 %vm149_vm0, %v2149_v20 }
  0x6e   :  { %1829 = vmatmul.msk.f32.gmra.mxu1 %vm149_vm0, %v108_v60 }
  0x70   :  { %1845 = vmatmul.msk.f32.gmra.mxu2 %vm149_vm0, %v124_v2  ;;  %v653_v2 = vld [vmem:[#allocation6 + $0x30] sm:$0x3f] }
  0x75   :  { %1800 = vmatmul.msk.f32.gmra.mxu0 %vm149_vm0, %v2158_v25 }
  0x76   :  { %1830 = vmatmul.msk.f32.gmra.mxu1 %vm149_vm0, %v109_v1 }
  0x78   :  { %1846 = vmatmul.msk.f32.gmra.mxu2 %vm149_vm0, %v125_v7  ;;  %v654_v7 = vld [vmem:[#allocation6 + $0x38] sm:$0x3f] }
  0x7d   :  { %1801 = vmatmul.msk.f32.gmra.mxu0 %vm149_vm0, %v2168_v30 }
  0x7e   :  { %1831 = vmatmul.msk.f32.gmra.mxu1 %vm149_vm0, %v110_v6  ;;  %v656_v6 = vld [vmem:[#allocation6 + $0x48] sm:$0x3f] }
  0x80   :  { %1847 = vmatmul.msk.f32.gmra.mxu2 %vm149_vm0, %v126_v17 }
  0x85   :  { %1802 = vmatmul.msk.f32.gmra.mxu0 %vm149_vm0, %v2123_v14 }
  0x86   :  { %1832 = vmatmul.msk.f32.gmra.mxu1 %vm149_vm0, %v111_v15 }
  0x88   :  { %1848 = vmatmul.msk.f32.gmra.mxu2 %vm149_vm0, %v127_v23 }
  0x8d   :  { %1803 = vmatmul.msk.f32.gmra.mxu0 %vm149_vm0, %v2140_v18 }
  0x8e   :  { %1833 = vmatmul.msk.f32.gmra.mxu1 %vm149_vm0, %v112_v22 }
  0x92   :  { %v407_v43 = vpop.f32.mrf.mxu0 }
  0x93   :  { %v2259_v33 = vpop.f32.mrf.mxu1 }
  0x95   :  { %1804 = vmatmul.msk.f32.gmra.mxu0 %vm149_vm0, %v83_v21  ;;  %v141_v21 = vmul.f32 %v93_v5, %v2133_v16  ;;  %v96_v16 = vld [vmem:[#allocation5 + $0x68] sm:$0xff] }
  0x96   :  { %v128_v27 = vmul.f32 %v96_v16, %v96_v16  ;;  %v144_v34 = vmul.f32 %v96_v16, %v2168_v30 }
  0x97   :  { %1862 = vmatmul.msk.f32.gmra.mxu3 %vm149_vm0, %v141_v21 }
  0x98   :  { %1849 = vmatmul.msk.f32.gmra.mxu2 %vm149_vm0, %v128_v27 }
  0x9a   :  { %v410_v48 = vpop.f32.mrf.mxu0 }
  0x9b   :  { %704 = vmatpush.msrb.mxu1 %v410_v48  ;;  %v2269_v38 = vpop.f32.mrf.mxu2  ;;  %v2288_v13 = vpop.f32.mrf.mxu3 }
  0x9d   :  { %1805 = vmatmul.msk.f32.gmra.mxu0 %vm149_vm0, %v84_v26  ;;  %705 = vmatpush.msrb.mxu1 %v407_v43  ;;  %v142_v26 = vmul.f32 %v94_v10, %v2149_v20  ;;  %v129_v20 = vmul.f32 %v2107_v11, %v2107_v11 }
  0x9f   :  { %1863 = vmatmul.msk.f32.gmra.mxu3 %vm149_vm0, %v142_v26 }
  0xa0   :  { %1850 = vmatmul.msk.f32.gmra.mxu2 %vm149_vm0, %v129_v20 }
  0xa2   :  { %v413_v53 = vpop.f32.mrf.mxu0 }
  0xa3   :  { %v2278_v41 = vpop.f32.mrf.mxu2  ;;  %v2294_v48 = vpop.f32.mrf.mxu3 }
  0xa5   :  { %1806 = vmatmul.msk.f32.gmra.mxu0 %vm149_vm0, %v85_v31  ;;  %v647_v31 = vld [vmem:[#allocation6] sm:$0x3f] }
  0xa6   :  { %1868 = vmatmul.msk.f32.vlgmr.msrb.gmra.mxu1 %vm149_vm0, %v647_v31 }
  0xa7   :  { %1864 = vmatmul.msk.f32.gmra.mxu3 %vm149_vm0, %v143_v29 }
  0xaa   :  { %v416_v57 = vpop.f32.mrf.mxu0 }
  0xab   :  { %727 = vmatpush.msrb.mxu2 %v416_v57  ;;  %v2282_v14 = vpop.f32.mrf.mxu2  ;;  %v2301_v52 = vpop.f32.mrf.mxu3 }
  0xad   :  { %1807 = vmatmul.msk.f32.gmra.mxu0 %vm149_vm0, %v86_v35  ;;  %728 = vmatpush.msrb.mxu2 %v413_v53  ;;  %v2265_v35 = vpop.f32.mrf.mxu1 }
  0xae   :  { %1869 = vmatmul.msk.f32.vlgmr.msrb.gmra.mxu2 %vm149_vm0, %v648_v37 }
  0xaf   :  { %1865 = vmatmul.msk.f32.gmra.mxu3 %vm149_vm0, %v144_v34 }
  0xb2   :  { %v419_v62 = vpop.f32.mrf.mxu0 }
  0xb3   :  { %v2290_v18 = vpop.f32.mrf.mxu2  ;;  %v2307_v57 = vpop.f32.mrf.mxu3 }
  0xb5   :  { %1808 = vmatmul.msk.f32.gmra.mxu0 %vm149_vm0, %v87_v39  ;;  %v2274_v39 = vpop.f32.mrf.mxu1 }
  0xb7   :  { %1866 = vmatmul.msk.f32.gmra.mxu3 %vm149_vm0, %v145_v36 }
  0xba   :  { %v422_v3 = vpop.f32.mrf.mxu0 }
  0xbb   :  { %750 = vmatpush.msrb.mxu3 %v422_v3  ;;  %v2312_v60 = vpop.f32.mrf.mxu3 }
  0xbd   :  { %1809 = vmatmul.msk.f32.gmra.mxu0 %vm149_vm0, %v88_v44  ;;  %751 = vmatpush.msrb.mxu3 %v419_v62  ;;  %v2284_v43 = vpop.f32.mrf.mxu1 }
  0xbf   :  { %1867 = vmatmul.msk.f32.gmra.mxu3 %vm149_vm0, %v146_v40  ;;  %v662_v40 = vld [vmem:[#allocation6 + $0x78] sm:$0x3f] }
  0xc2   :  { %v425_v8 = vpop.f32.mrf.mxu0 }
  0xc5   :  { %1810 = vmatmul.msk.f32.gmra.mxu0 %vm149_vm0, %v89_v49  ;;  %v2292_v45 = vpop.f32.mrf.mxu1  ;;  %v2297_v49 = vpop.f32.mrf.mxu2 }
  0xc7   :  { %1870 = vmatmul.msk.f32.vlgmr.msrb.gmra.mxu3 %vm149_vm0, %v649_v42 }
  0xca   :  { %v428_v19 = vpop.f32.mrf.mxu0 }
  0xcb   :  { %773 = vmatpush.msra.mxu1 %v428_v19  ;;  %v657_v19 = vld [vmem:[#allocation6 + $0x50] sm:$0x3f] }
  0xcd   :  { %1811 = vmatmul.msk.f32.gmra.mxu0 %vm149_vm0, %v90_v54  ;;  %774 = vmatpush.msra.mxu1 %v425_v8  ;;  %v2299_v50 = vpop.f32.mrf.mxu1  ;;  %v2303_v53 = vpop.f32.mrf.mxu2 }
  0xce   :  { %1871 = vmatmul.msk.f32.vlgmr.msra.gmra.mxu1 %vm149_vm0, %v650_v47  ;;  %v665_v47 = vld [vmem:[#allocation6 + $0x90] sm:$0x3f] }
  0xd2   :  { %v431_v24 = vpop.f32.mrf.mxu0 }
  0xd5   :  { %1812 = vmatmul.msk.f32.gmra.mxu0 %vm149_vm0, %v91_v59  ;;  %v2305_v55 = vpop.f32.mrf.mxu1  ;;  %v2310_v59 = vpop.f32.mrf.mxu2 }
  0xda   :  { %v434_v28 = vpop.f32.mrf.mxu0 }
  0xdb   :  { %796 = vmatpush.msra.mxu2 %v434_v28 }
  0xdd   :  { %1813 = vmatmul.msk.f32.gmra.mxu0 %vm149_vm0, %v92_v0  ;;  %797 = vmatpush.msra.mxu2 %v431_v24  ;;  %v518_v61 = vpop.f32.mrf.mxu1  ;;  %v2314_v0 = vpop.f32.mrf.mxu3 }
  0xde   :  { %1872 = vmatmul.msk.f32.vlgmr.msra.gmra.mxu2 %vm149_vm0, %v651_v56  ;;  %v2317_v1 = vpop.f32.mrf.mxu2 }
  0xe2   :  { %v437_v32 = vpop.f32.mrf.mxu0 }
  0xe5   :  { %1814 = vmatmul.msk.f32.gmra.mxu0 %vm149_vm0, %v93_v5  ;;  %v2319_v3 = vpop.f32.mrf.mxu1  ;;  %v2322_v5 = vpop.f32.mrf.mxu3 }
  0xe6   :  { %v2326_v8 = vpop.f32.mrf.mxu2 }
  0xea   :  { %v440_v25 = vpop.f32.mrf.mxu0 }
  0xeb   :  { %819 = vmatpush.msra.mxu3 %v440_v25  ;;  %v659_v25 = vld [vmem:[#allocation6 + $0x60] sm:$0x3f] }
  0xed   :  { %1815 = vmatmul.msk.f32.gmra.mxu0 %vm149_vm0, %v94_v10  ;;  %820 = vmatpush.msra.mxu3 %v437_v32  ;;  %v524_v10 = vpop.f32.mrf.mxu1  ;;  %v2329_v17 = vpop.f32.mrf.mxu3 }
  0xee   :  { %1873 = vmatmul.msk.f32.vlgmr.msra.gmra.mxu3 %vm149_vm0, %v652_v63  ;;  %v572_v21 = vpop.f32.mrf.mxu2 }
  0xf2   :  { %v443_v30 = vpop.f32.mrf.mxu0 }
  0xf5   :  { %1816 = vmatmul.msk.f32.gmra.mxu0 %vm149_vm0, %v95_v12  ;;  %v2332_v22 = vpop.f32.mrf.mxu1  ;;  %v2334_v23 = vpop.f32.mrf.mxu3 }
  0xf6   :  { %v2336_v26 = vpop.f32.mrf.mxu2 }
  0xfa   :  { %v446_v11 = vpop.f32.mrf.mxu0 }
  0xfb   :  { %842 = vmatpush.msrb.mxu1 %v446_v11 }
  0xfd   :  { %1817 = vmatmul.msk.f32.gmra.mxu0 %vm149_vm0, %v96_v16  ;;  %843 = vmatpush.msrb.mxu1 %v443_v30  ;;  %v658_v16 = vld [vmem:[#allocation6 + $0x58] sm:$0x3f]  ;;  %v2338_v27 = vpop.f32.mrf.mxu1  ;;  %v2341_v28 = vpop.f32.mrf.mxu3 }
  0xfe   :  { %1874 = vmatmul.msk.f32.vlgmr.msrb.gmra.mxu1 %vm149_vm0, %v653_v2  ;;  %v2343_v31 = vpop.f32.mrf.mxu2  ;;  %v664_v2 = vld [vmem:[#allocation6 + $0x88] sm:$0x3f] }
 0x102   :  { %v449_v44 = vpop.f32.mrf.mxu0 }
 0x105   :  { %v533_v20 = vpop.f32.mrf.mxu1  ;;  %v2345_v32 = vpop.f32.mrf.mxu3 }
 0x106   :  { %v2349_v36 = vpop.f32.mrf.mxu2 }
 0x10a   :  { %v452_v46 = vpop.f32.mrf.mxu0 }
 0x10b   :  { %865 = vmatpush.msrb.mxu2 %v452_v46  ;;  %v660_v46 = vld [vmem:[#allocation6 + $0x68] sm:$0x3f] }
 0x10d   :  { %866 = vmatpush.msrb.mxu2 %v449_v44  ;;  %v536_v37 = vpop.f32.mrf.mxu1 }
 0x10e   :  { %1875 = vmatmul.msk.f32.vlgmr.msrb.gmra.mxu2 %vm149_vm0, %v654_v7  ;;  %v2356_v42 = vpop.f32.mrf.mxu2  ;;  %v683_v7 = vld [vmem:[#allocation6 + $0x120] sm:$0x3f] }
 0x112   :  { %v455_v51 = vpop.f32.mrf.mxu0 }
 0x116   :  { %v587_v56 = vpop.f32.mrf.mxu2 }
 0x11a   :  { %v458_v54 = vpop.f32.mrf.mxu0  ;;  %v2352_v11 = vpop.f32.mrf.mxu3 }
 0x11b   :  { %888 = vmatpush.msrb.mxu3 %v458_v54  ;;  %v663_v54 = vld [vmem:[#allocation6 + $0x80] sm:$0x3f] }
 0x11d   :  { %889 = vmatpush.msrb.mxu3 %v455_v51 }
 0x11e   :  { %1876 = vmatmul.msk.f32.vlgmr.msrb.gmra.mxu3 %vm149_vm0, %v655_v9  ;;  %v686_v9 = vld [vmem:[#allocation6 + $0x138] sm:$0x3f] }
 0x122   :  { %v461_v58 = vpop.f32.mrf.mxu0 }
 0x12a   :  { %v464_v62 = vpop.f32.mrf.mxu0 }
 0x12b   :  { %911 = vmatpush.msra.mxu1 %v464_v62  ;;  %v590_v62 = vpop.f32.mrf.mxu2 }
 0x12d   :  { %912 = vmatpush.msra.mxu1 %v461_v58 }
 0x12e   :  { %1877 = vmatmul.msk.f32.vlgmr.msra.gmra.mxu1 %vm149_vm0, %v656_v6 }
 0x132   :  { %v467_v4 = vpop.f32.mrf.mxu0 }
 0x13a   :  { %v470_v15 = vpop.f32.mrf.mxu0 }
 0x13b   :  { %934 = vmatpush.msra.mxu2 %v470_v15  ;;  %v684_v15 = vld [vmem:[#allocation6 + $0x128] sm:$0x3f] }
 0x13d   :  { %935 = vmatpush.msra.mxu2 %v467_v4  ;;  %v674_v4 = vld [vmem:[#allocation6 + $0xd8] sm:$0x3f] }
 0x13e   :  { %1878 = vmatmul.msk.f32.vlgmr.msra.gmra.mxu2 %vm149_vm0, %v657_v19 }
 0x142   :  { %v473_v12 = vpop.f32.mrf.mxu0 }
 0x14a   :  { %v476_v24 = vpop.f32.mrf.mxu0 }
 0x14b   :  { %957 = vmatpush.msra.mxu3 %v476_v24  ;;  %v685_v24 = vld [vmem:[#allocation6 + $0x130] sm:$0x3f] }
 0x14d   :  { %958 = vmatpush.msra.mxu3 %v473_v12  ;;  %v682_v12 = vld [vmem:[#allocation6 + $0x118] sm:$0x3f] }
 0x14e   :  { %1879 = vmatmul.msk.f32.vlgmr.msra.gmra.mxu3 %vm149_vm0, %v658_v16 }
 0x152   :  { %v479_v29 = vpop.f32.mrf.mxu0 }
 0x15a   :  { %v482_v34 = vpop.f32.mrf.mxu0 }
 0x15b   :  { %980 = vmatpush.msrb.mxu1 %v482_v34 }
 0x15d   :  { %981 = vmatpush.msrb.mxu1 %v479_v29 }
 0x15e   :  { %1880 = vmatmul.msk.f32.vlgmr.msrb.gmra.mxu1 %vm149_vm0, %v659_v25 }
 0x15f   :  { %1049 = vmatpush.msra.mxu1 %v2265_v35  ;;  %v539_v35 = vpop.f32.mrf.mxu1 }
 0x161   :  { %1050 = vmatpush.msra.mxu1 %v2259_v33  ;;  %v2358_v33 = vpop.f32.mrf.mxu3 }
 0x162   :  { %v485_v30 = vpop.f32.mrf.mxu0 }
 0x163   :  { %1118 = vmatpush.msrb.mxu1 %v518_v61  ;;  %v671_v61 = vld [vmem:[#allocation6 + $0xc0] sm:$0x3f] }
 0x165   :  { %1119 = vmatpush.msrb.mxu1 %v2305_v55  ;;  %v668_v55 = vld [vmem:[#allocation6 + $0xa8] sm:$0x3f] }
 0x166   :  { %1883 = vmatmul.msk.f32.vlgmr.msra.gmra.mxu1 %vm149_vm0, %v662_v40 }
 0x167   :  { %1187 = vmatpush.msra.mxu1 %v536_v37  ;;  %v542_v58 = vpop.f32.mrf.mxu1 }
 0x169   :  { %1188 = vmatpush.msra.mxu1 %v533_v20 }
 0x16a   :  { %v488_v44 = vpop.f32.mrf.mxu0 }
 0x16b   :  { %1003 = vmatpush.msrb.mxu2 %v488_v44 }
 0x16d   :  { %1004 = vmatpush.msrb.mxu2 %v485_v30 }
 0x16e   :  { %1881 = vmatmul.msk.f32.vlgmr.msrb.gmra.mxu2 %vm149_vm0, %v660_v46  ;;  %1886 = vmatmul.msk.f32.vlgmr.msrb.gmra.mxu1 %vm149_vm0, %v665_v47 }
 0x16f   :  { %1072 = vmatpush.msra.mxu2 %v2284_v43  ;;  %1256 = vmatpush.msrb.mxu1 %v2290_v18  ;;  %v2369_v43 = vpop.f32.mrf.mxu3  ;;  %v666_v18 = vld [vmem:[#allocation6 + $0x98] sm:$0x3f] }
 0x171   :  { %1073 = vmatpush.msra.mxu2 %v2274_v39  ;;  %1257 = vmatpush.msrb.mxu1 %v2282_v14  ;;  %v661_v14 = vld [vmem:[#allocation6 + $0x70] sm:$0x3f] }
 0x172   :  { %v491_v51 = vpop.f32.mrf.mxu0 }
 0x173   :  { %1141 = vmatpush.msrb.mxu2 %v524_v10 }
 0x175   :  { %1142 = vmatpush.msrb.mxu2 %v2319_v3  ;;  %v669_v3 = vld [vmem:[#allocation6 + $0xb0] sm:$0x3f] }
 0x176   :  { %1884 = vmatmul.msk.f32.vlgmr.msra.gmra.mxu2 %vm149_vm0, %v663_v54  ;;  %1889 = vmatmul.msk.f32.vlgmr.msra.gmra.mxu1 %vm149_vm0, %v668_v55 }
 0x177   :  { %1325 = vmatpush.msra.mxu1 %v572_v21  ;;  %1210 = vmatpush.msra.mxu2 %v542_v58  ;;  %v2378_v63 = vpop.f32.mrf.mxu3 }
 0x179   :  { %1326 = vmatpush.msra.mxu1 %v2326_v8  ;;  %1211 = vmatpush.msra.mxu2 %v539_v35  ;;  %v681_v8 = vld [vmem:[#allocation6 + $0x110] sm:$0x3f] }
 0x17a   :  { %v494_v39 = vpop.f32.mrf.mxu0 }
 0x17b   :  { %1026 = vmatpush.msrb.mxu3 %v494_v39 }
 0x17d   :  { %1027 = vmatpush.msrb.mxu3 %v491_v51 }
 0x17e   :  { %1882 = vmatmul.msk.f32.vlgmr.msrb.gmra.mxu3 %vm149_vm0, %v661_v14  ;;  %1887 = vmatmul.msk.f32.vlgmr.msrb.gmra.mxu2 %vm149_vm0, %v666_v18 }
 0x17f   :  { %1095 = vmatpush.msra.mxu3 %v2299_v50  ;;  %1892 = vmatmul.msk.f32.vlgmr.msrb.gmra.mxu1 %vm149_vm0, %v671_v61  ;;  %v641_v50 = vpop.f32.mrf.mxu3  ;;  %v2471_v61 = vstv %s65_s1 }
 0x180   :  { %1279 = vmatpush.msrb.mxu2 %v2303_v53  ;;  %1394 = vmatpush.msrb.mxu1 %v590_v62  ;;  %v677_v53 = vld [vmem:[#allocation6 + $0xf0] sm:$0x3f]  ;;  %v2473_v62 = vstv %s1787_s13 }
 0x181   :  { %1096 = vmatpush.msra.mxu3 %v2292_v45  ;;  %v667_v45 = vld [vmem:[#allocation6 + $0xa0] sm:$0x3f] }
 0x182   :  { %1280 = vmatpush.msrb.mxu2 %v2297_v49  ;;  %1395 = vmatpush.msrb.mxu1 %v587_v56  ;;  %v672_v49 = vld [vmem:[#allocation6 + $0xc8] sm:$0x3f] }
 0x183   :  { %1164 = vmatpush.msrb.mxu3 %v2338_v27 }
 0x185   :  { %1165 = vmatpush.msrb.mxu3 %v2332_v22 }
 0x186   :  { %1885 = vmatmul.msk.f32.vlgmr.msra.gmra.mxu3 %vm149_vm0, %v664_v2  ;;  %1890 = vmatmul.msk.f32.vlgmr.msra.gmra.mxu2 %vm149_vm0, %v669_v3 }
 0x187   :  { %1233 = vmatpush.msra.mxu3 %v2278_v41  ;;  %1895 = vmatmul.msk.f32.vlgmr.msra.gmra.mxu1 %vm149_vm0, %v674_v4  ;;  %v593_v41 = vpop.f32.mrf.mxu2  ;;  %v644_v6 = vpop.f32.mrf.mxu3 }
 0x188   :  { %1348 = vmatpush.msra.mxu2 %v2343_v31  ;;  %1463 = vmatpush.msra.mxu1 %v2312_v60  ;;  %v680_v60 = vld [vmem:[#allocation6 + $0x108] sm:$0x3f] }
 0x189   :  { %1234 = vmatpush.msra.mxu3 %v2269_v38  ;;  %v670_v38 = vld [vmem:[#allocation6 + $0xb8] sm:$0x3f] }
 0x18a   :  { %1349 = vmatpush.msra.mxu2 %v2336_v26  ;;  %1464 = vmatpush.msra.mxu1 %v2307_v57  ;;  %v675_v57 = vld [vmem:[#allocation6 + $0xe0] sm:$0x3f] }
 0x18e   :  { %1888 = vmatmul.msk.f32.vlgmr.msrb.gmra.mxu3 %vm149_vm0, %v667_v45  ;;  %1893 = vmatmul.msk.f32.vlgmr.msrb.gmra.mxu2 %vm149_vm0, %v672_v49 }
 0x18f   :  { %1302 = vmatpush.msrb.mxu3 %v2317_v1  ;;  %1898 = vmatmul.msk.f32.vlgmr.msrb.gmra.mxu1 %vm149_vm0, %v677_v53  ;;  %v678_v1 = vld [vmem:[#allocation6 + $0xf8] sm:$0x3f]  ;;  %v2423_v10 = vpop.f32.mrf.mxu3 }
 0x190   :  { %1417 = vmatpush.msrb.mxu2 %v2288_v13  ;;  %1532 = vmatpush.msrb.mxu1 %v2345_v32  ;;  %v2404_v13 = vpop.f32.mrf.mxu1 }
 0x191   :  { %1303 = vmatpush.msrb.mxu3 %v2310_v59  ;;  %v673_v59 = vld [vmem:[#allocation6 + $0xd0] sm:$0x3f] }
 0x192   :  { %1533 = vmatpush.msrb.mxu1 %v2341_v28  ;;  %1418 = vmatpush.msrb.mxu2 %v593_v41 }
 0x196   :  { %1891 = vmatmul.msk.f32.vlgmr.msra.gmra.mxu3 %vm149_vm0, %v670_v38  ;;  %1896 = vmatmul.msk.f32.vlgmr.msra.gmra.mxu2 %vm149_vm0, %v675_v57 }
 0x197   :  { %1371 = vmatpush.msra.mxu3 %v2356_v42  ;;  %1901 = vmatmul.msk.f32.vlgmr.msra.gmra.mxu1 %vm149_vm0, %v680_v60 }
 0x198   :  { %1486 = vmatpush.msra.mxu2 %v2322_v5  ;;  %1601 = vmatpush.msra.mxu1 %v644_v6  ;;  %v2415_v5 = vpop.f32.mrf.mxu1 }
 0x199   :  { %1372 = vmatpush.msra.mxu3 %v2349_v36 }
 0x19a   :  { %1487 = vmatpush.msra.mxu2 %v2314_v0  ;;  %1602 = vmatpush.msra.mxu1 %v641_v50  ;;  %v676_v0 = vld [vmem:[#allocation6 + $0xe8] sm:$0x3f] }
 0x19e   :  { %1894 = vmatmul.msk.f32.vlgmr.msrb.gmra.mxu3 %vm149_vm0, %v673_v59  ;;  %1899 = vmatmul.msk.f32.vlgmr.msrb.gmra.mxu2 %vm149_vm0, %v678_v1 }
 0x19f   :  { %1440 = vmatpush.msrb.mxu3 %v2301_v52  ;;  %1904 = vmatmul.msk.f32.vlgmr.msrb.gmra.mxu1 %vm149_vm0, %v683_v7  ;;  %v730_v52 = vpop.f32.mrf.mxu2 }
 0x1a0   :  { %1555 = vmatpush.msrb.mxu2 %v2358_v33  ;;  %v2425_v19 = vpop.f32.mrf.mxu1  ;;  %v1608_v51 = vmul.f32 %v730_v52, %v730_v52 }
 0x1a1   :  { %1441 = vmatpush.msrb.mxu3 %v2294_v48  ;;  %v679_v48 = vld [vmem:[#allocation6 + $0x100] sm:$0x3f] }
 0x1a2   :  { %1556 = vmatpush.msrb.mxu2 %v2352_v11 }
 0x1a6   :  { %1897 = vmatmul.msk.f32.vlgmr.msra.gmra.mxu3 %vm149_vm0, %v676_v0  ;;  %1902 = vmatmul.msk.f32.vlgmr.msra.gmra.mxu2 %vm149_vm0, %v681_v8 }
 0x1a7   :  { %1509 = vmatpush.msra.mxu3 %v2334_v23  ;;  %1907 = vmatmul.msk.f32.vlgmr.msra.gmra.mxu1 %vm149_vm0, %v686_v9  ;;  %v799_v21 = vpop.f32.mrf.mxu2  ;;  %v2431_v23 = vpop.f32.mrf.mxu3  ;;  %v1609_v9 = vmul.f32 %v2423_v10, %v2423_v10 }
 0x1a8   :  { %v1611_v3 = vmul.f32 %v799_v21, %v799_v21 }
 0x1a9   :  { %1510 = vmatpush.msra.mxu3 %v2329_v17 }
 0x1ab   :  { %v914_v22 = vpop.f32.mrf.mxu1 }
 0x1ac   :  { %v1624_v17 = vmul.f32 %v914_v22, %v730_v52  ;;  %v1616_v54 = vmul.f32 %v914_v22, %v914_v22 }
 0x1ae   :  { %1900 = vmatmul.msk.f32.vlgmr.msrb.gmra.mxu3 %vm149_vm0, %v679_v48  ;;  %1905 = vmatmul.msk.f32.vlgmr.msrb.gmra.mxu2 %vm149_vm0, %v684_v15  ;;  %v1714_v58 = vadd.f32 %v1616_v54, %v1608_v51  ;;  %v1689_v53 = vmul.f32 2.0, %v1624_v17 }
 0x1af   :  { %1578 = vmatpush.msrb.mxu3 %v2378_v63  ;;  %v2434_v26 = vpop.f32.mrf.mxu2  ;;  %v891_v16 = vpop.f32.mrf.mxu3 }
 0x1b0   :  { %v2438_v27 = vmul.f32 %v891_v16, %v2404_v13  ;;  %v1722_v2 = vadd.f32 %v1714_v58, %v2471_v61  ;;  %v1698_v0 = vadd.f32 %v2471_v61, %v1689_v53  ;;  %v1610_v53 = vmul.f32 %v2415_v5, %v2415_v5 }
 0x1b1   :  { %1579 = vmatpush.msrb.mxu3 %v2369_v43 }
 0x1b6   :  { %1903 = vmatmul.msk.f32.vlgmr.msra.gmra.mxu3 %vm149_vm0, %v682_v12 }
 0x1be   :  { %1906 = vmatmul.msk.f32.vlgmr.msrb.gmra.mxu3 %vm149_vm0, %v685_v24 }
 0x1c1   :  { %v937_v28 = vpop.f32.mrf.mxu2 }
 0x1c2   :  { %v2441_v29 = vmul.f32 %v937_v28, %v2423_v10  ;;  %v1617_v48 = vmul.f32 %v937_v28, %v937_v28  ;;  %v1607_v28 = vmul.f32 %v2404_v13, %v2404_v13 }
 0x1d1   :  { %v2443_v31 = vpop.f32.mrf.mxu3 }
 0x1d2   :  { %v2447_v20 = vmul.f32 %v2443_v31, %v2415_v5  ;;  %v1618_v13 = vmul.f32 %v2443_v31, %v2443_v31 }
 0x1db   :  { %v983_v32 = vpop.f32.mrf.mxu1 }
 0x1dc   :  { %v1627_v34 = vmul.f32 %v983_v32, %v799_v21  ;;  %v1619_v4 = vmul.f32 %v983_v32, %v983_v32  ;;  %v1615_v32 = vmul.f32 %v891_v16, %v891_v16 }
 0x1de   :  { %v1717_v57 = vadd.f32 %v1619_v4, %v1611_v3  ;;  %v1692_v24 = vmul.f32 2.0, %v1627_v34 }
 0x1e0   :  { %v1725_v52 = vadd.f32 %v1717_v57, %v2471_v61  ;;  %v1701_v16 = vadd.f32 %v2471_v61, %v1692_v24 }
 0x1e3   :  { %v2449_v25 = vpop.f32.mrf.mxu1 }
 0x1eb   :  { %v2451_v36 = vpop.f32.mrf.mxu1 }
 0x1f1   :  { %v2453_v37 = vpop.f32.mrf.mxu2 }
 0x1f3   :  { %v2455_v30 = vpop.f32.mrf.mxu1 }
 0x1f9   :  { %v2457_v40 = vpop.f32.mrf.mxu2 }
 0x1fc   :  { %v2459_v11 = vpop.f32.mrf.mxu1 }
 0x1fd   :  { %v1639_v58 = vsub.f32 %v2459_v11, %v1615_v32 }
 0x201   :  { %v2461_v42 = vpop.f32.mrf.mxu3  ;;  %v2463_v44 = vpop.f32.mrf.mxu2 }
 0x204   :  { %v2465_v35 = vpop.f32.mrf.mxu1 }
 0x209   :  { %v1098_v46 = vpop.f32.mrf.mxu3  ;;  %v2467_v47 = vpop.f32.mrf.mxu2 }
 0x20a   :  { %v1632_v43 = vsub.f32 %v1098_v46, %v1608_v51 }
 0x20c   :  { %v2469_v33 = vpop.f32.mrf.mxu1 }
 0x211   :  { %v1167_v55 = vpop.f32.mrf.mxu3  ;;  %v1282_v56 = vpop.f32.mrf.mxu2 }
 0x212   :  { %v1640_v39 = vsub.f32 %v1282_v56, %v1616_v54  ;;  %v1635_v60 = vsub.f32 %v1167_v55, %v1611_v3  ;;  %v1715_v55 = vadd.f32 %v1617_v48, %v1609_v9  ;;  %v1633_v56 = vsub.f32 %v2451_v36, %v1609_v9 }
 0x214   :  { %v1673_v14 = vadd.f32 %v1640_v39, %v1632_v43  ;;  %v1466_v18 = vpop.f32.mrf.mxu1 }
 0x215   :  { %v1648_v63 = vsub.f32 %v1466_v18, %v1624_v17 }
 0x216   :  { %v1681_v45 = vadd.f32 %v1673_v14, %v2473_v62  ;;  %v1723_v14 = vadd.f32 %v1715_v55, %v2471_v61 }
 0x217   :  { %v1656_v49 = vmul.f32 2.0, %v1648_v63 }
 0x218   :  { %v1730_v50 = vmul.f32 %v1722_v2, %v1681_v45 }
 0x219   :  { %v2477_v41 = vpop.f32.mrf.mxu3  ;;  %v1351_v38 = vpop.f32.mrf.mxu2  ;;  %v1665_v59 = vadd.f32 %v2473_v62, %v1656_v49 }
 0x21a   :  { %1921 = vrcp.f32 %v1730_v50  ;;  %v1643_v6 = vsub.f32 %v1351_v38, %v1619_v4  ;;  %v1713_v4 = vadd.f32 %v1615_v32, %v1607_v28  ;;  %v1690_v50 = vmul.f32 2.0, %v2441_v29 }
 0x21b   :  { %v1706_v21 = vmul.f32 %v1698_v0, %v1665_v59  ;;  %v1620_v38 = vmul.f32 %v2453_v37, %v2453_v37  ;;  %v1622_v0 = vmul.f32 %v2449_v25, %v2449_v25 }
 0x21c   :  { %v1676_v1 = vadd.f32 %v1643_v6, %v1635_v60  ;;  %v1535_v7 = vpop.f32.mrf.mxu1  ;;  %v1642_v60 = vsub.f32 %v2465_v35, %v1618_v13  ;;  %v1612_v6 = vmul.f32 %v2431_v23, %v2431_v23  ;;  %v1721_v59 = vadd.f32 %v1713_v4, %v2471_v61 }
 0x21d   :  { %v1651_v8 = vsub.f32 %v1535_v7, %v1627_v34  ;;  %v1631_v34 = vsub.f32 %v2457_v40, %v1607_v28 }
 0x21e   :  { %v1684_v15 = vadd.f32 %v1676_v1, %v2473_v62  ;;  %v1634_v1 = vsub.f32 %v2463_v44, %v1610_v53  ;;  %v1718_v32 = vadd.f32 %v1620_v38, %v1612_v6 }
 0x21f   :  { %v1659_v12 = vmul.f32 2.0, %v1651_v8  ;;  %v1672_v63 = vadd.f32 %v1639_v58, %v1631_v34  ;;  %v1636_v8 = vsub.f32 %v2455_v30, %v1612_v6  ;;  %v1688_v30 = vmul.f32 2.0, %v2438_v27 }
 0x220   :  { %v1922_v22 = vpop.eup %1921  ;;  %v1733_v17 = vmul.f32 %v1725_v52, %v1684_v15  ;;  %v1675_v35 = vadd.f32 %v1642_v60, %v1634_v1  ;;  %v1614_v15 = vmul.f32 %v2434_v26, %v2434_v26 }
 0x221   :  { %v2485_v46 = vmul.f32 %v1922_v22, %v1706_v21  ;;  %v1305_v51 = vpop.f32.mrf.mxu3  ;;  %v2487_v54 = vpop.f32.mrf.mxu2  ;;  %v1668_v43 = vadd.f32 %v2473_v62, %v1659_v12  ;;  %v1680_v57 = vadd.f32 %v1672_v63, %v2473_v62  ;;  %v1716_v21 = vadd.f32 %v1618_v13, %v1610_v53 }
 0x222   :  { %1923 = vrcp.f32 %v1733_v17  ;;  %v1641_v10 = vsub.f32 %v1305_v51, %v1617_v48  ;;  %v1613_v48 = vmul.f32 %v2425_v19, %v2425_v19  ;;  %v1621_v12 = vmul.f32 %v2461_v42, %v2461_v42 }
 0x223   :  { %v1709_v36 = vmul.f32 %v1701_v16, %v1668_v43  ;;  %v1729_v9 = vmul.f32 %v1721_v59, %v1680_v57  ;;  %v1646_v22 = vsub.f32 %v2487_v54, %v1622_v0  ;;  %v1638_v28 = vsub.f32 %v2477_v41, %v1614_v15 }
 0x224   :  { %v1674_v39 = vadd.f32 %v1641_v10, %v1633_v56  ;;  %v1683_v56 = vadd.f32 %v1675_v35, %v2473_v62  ;;  %v1645_v10 = vsub.f32 %v2469_v33, %v1621_v12  ;;  %v1691_v43 = vmul.f32 2.0, %v2447_v20 }
 0x225   :  { %v1628_v54 = vmul.f32 %v2453_v37, %v2431_v23  ;;  %v1724_v16 = vadd.f32 %v1716_v21, %v2471_v61  ;;  %v1637_v34 = vsub.f32 %v2467_v47, %v1613_v48  ;;  %v1720_v41 = vadd.f32 %v1622_v0, %v1614_v15 }
 0x226   :  { %v1682_v18 = vadd.f32 %v1674_v39, %v2473_v62  ;;  %v1700_v23 = vadd.f32 %v2471_v61, %v1691_v43  ;;  %v1719_v13 = vadd.f32 %v1621_v12, %v1613_v48  ;;  %v1755_v59 = vsel %vm1753_vm1, %v2485_v46, 0.0 }
 0x227   :  { %v1728_v60 = vadd.f32 %v1720_v41, %v2471_v61 }
 0x228   :  { %v1924_v2 = vpop.eup %1923  ;;  %v1731_v3 = vmul.f32 %v1723_v14, %v1682_v18  ;;  %v1679_v14 = vadd.f32 %v1646_v22, %v1638_v28  ;;  %v1697_v18 = vadd.f32 %v2471_v61, %v1688_v30 }
 0x229   :  { %v2500_v11 = vmul.f32 %v1924_v2, %v1709_v36  ;;  %v1374_v45 = vpop.f32.mrf.mxu3  ;;  %v1489_v49 = vpop.f32.mrf.mxu2  ;;  %v1726_v36 = vadd.f32 %v1718_v32, %v2471_v61  ;;  %v1732_v2 = vmul.f32 %v1724_v16, %v1683_v56 }
 0x22a   :  { %1925 = vrcp.f32 %v1731_v3  ;;  %v1649_v40 = vsub.f32 %v1489_v49, %v2441_v29  ;;  %v1644_v7 = vsub.f32 %v1374_v45, %v1620_v38  ;;  %v1699_v29 = vadd.f32 %v2471_v61, %v1690_v50  ;;  %v1604_v45 = vpop.f32.mrf.mxu1 }
 0x22b   :  { %1927 = vrcp.f32 %v1729_v9  ;;  %v1678_v3 = vadd.f32 %v1645_v10, %v1637_v34  ;;  %v1687_v47 = vadd.f32 %v1679_v14, %v2473_v62  ;;  %v1761_v43 = vsel %vm1753_vm1, %v2500_v11, 0.0 }
 0x22c   :  { %v1657_v31 = vmul.f32 2.0, %v1649_v40  ;;  %v1677_v17 = vadd.f32 %v1644_v7, %v1636_v8  ;;  %v1630_v40 = vmul.f32 %v2449_v25, %v2434_v26  ;;  %1929 = vrcp.f32 %v1732_v2 }
 0x22d   :  { %v1686_v6 = vadd.f32 %v1678_v3, %v2473_v62  ;;  %v1736_v26 = vmul.f32 %v1728_v60, %v1687_v47 }
 0x22e   :  { %v1666_v5 = vadd.f32 %v2473_v62, %v1657_v31  ;;  %v1693_v31 = vmul.f32 2.0, %v1628_v54  ;;  %v1654_v1 = vsub.f32 %v1604_v45, %v1630_v40  ;;  %v1695_v21 = vmul.f32 2.0, %v1630_v40 }
 0x230   :  { %v1926_v52 = vpop.eup %1925  ;;  %v1707_v44 = vmul.f32 %v1699_v29, %v1666_v5  ;;  %v1727_v5 = vadd.f32 %v1719_v13, %v2471_v61  ;;  %v1662_v48 = vmul.f32 2.0, %v1654_v1 }
 0x231   :  { %v1443_v24 = vpop.f32.mrf.mxu3  ;;  %v1558_v58 = vpop.f32.mrf.mxu2 }
 0x232   :  { %v1747_v51 = vmul.f32 %v1926_v52, %v1707_v44  ;;  %v1647_v55 = vsub.f32 %v1443_v24, %v2438_v27  ;;  %v1685_v27 = vadd.f32 %v1677_v17, %v2473_v62  ;;  %v1652_v63 = vsub.f32 %v1558_v58, %v1628_v54  ;;  %v1928_v4 = vpop.eup %1927 }
 0x233   :  { %v1735_v35 = vmul.f32 %v1727_v5, %v1686_v6  ;;  %v1702_v52 = vadd.f32 %v2471_v61, %v1693_v31  ;;  %v1930_v44 = vpop.eup %1929  ;;  %v1671_v30 = vadd.f32 %v2473_v62, %v1662_v48 }
 0x234   :  { %v1655_v39 = vmul.f32 2.0, %v1647_v55  ;;  %v1734_v49 = vmul.f32 %v1726_v36, %v1685_v27  ;;  %v1660_v38 = vmul.f32 2.0, %v1652_v63  ;;  %v1757_v0 = vsel %vm1753_vm1, %v1747_v51, 0.0 }
 0x235   :  { %v1704_v55 = vadd.f32 %v2471_v61, %v1695_v21 }
 0x236   :  { %v1664_v33 = vadd.f32 %v2473_v62, %v1655_v39  ;;  %1931 = vrcp.f32 %v1734_v49  ;;  %v1669_v8 = vadd.f32 %v2473_v62, %v1660_v38 }
 0x237   :  { %1933 = vrcp.f32 %v1736_v26  ;;  %v1712_v34 = vmul.f32 %v1704_v55, %v1671_v30 }
 0x238   :  { %v1705_v37 = vmul.f32 %v1697_v18, %v1664_v33  ;;  %v1710_v17 = vmul.f32 %v1702_v52, %v1669_v8  ;;  %1935 = vrcp.f32 %v1735_v35 }
 0x239   :  { %v1512_v50 = vpop.f32.mrf.mxu3 }
 0x23a   :  { %v1745_v53 = vmul.f32 %v1928_v4, %v1705_v37  ;;  %v1650_v57 = vsub.f32 %v1512_v50, %v2447_v20  ;;  %v1629_v20 = vmul.f32 %v2461_v42, %v2425_v19 }
 0x23c   :  { %v1754_v7 = vsel %vm1753_vm1, %v1745_v53, 0.0  ;;  %v1658_v29 = vmul.f32 2.0, %v1650_v57  ;;  %v1694_v22 = vmul.f32 2.0, %v1629_v20  ;;  %v1932_v42 = vpop.eup %1931 }
 0x23d   :  { %v1756_v25 = vadd.f32 %v1755_v59, %v1754_v7  ;;  %v1750_v58 = vmul.f32 %v1932_v42, %v1710_v17  ;;  %v1934_v54 = vpop.eup %1933 }
 0x23e   :  { %v1667_v9 = vadd.f32 %v2473_v62, %v1658_v29  ;;  %v1703_v10 = vadd.f32 %v2471_v61, %v1694_v22  ;;  %v1936_v14 = vpop.eup %1935  ;;  %v1752_v18 = vmul.f32 %v1934_v54, %v1712_v34 }
 0x23f   :  { %v1758_v46 = vadd.f32 %v1757_v0, %v1756_v25  ;;  %v1763_v33 = vsel %vm1753_vm1, %v1750_v58, 0.0 }
 0x240   :  { %v1708_v15 = vmul.f32 %v1700_v23, %v1667_v9  ;;  %v1767_v61 = vsel %vm1753_vm1, %v1752_v18, 0.0 }
 0x241   :  { %v1581_v12 = vpop.f32.mrf.mxu3 }
 0x242   :  { %v1748_v24 = vmul.f32 %v1930_v44, %v1708_v15  ;;  %v1653_v19 = vsub.f32 %v1581_v12, %v1629_v20 }
 0x244   :  { %v1661_v32 = vmul.f32 2.0, %v1653_v19  ;;  %v1759_v51 = vsel %vm1753_vm1, %v1748_v24, 0.0 }
 0x245   :  { %v1760_v56 = vadd.f32 %v1759_v51, %v1758_v46 }
 0x246   :  { %v1670_v28 = vadd.f32 %v2473_v62, %v1661_v32 }
 0x247   :  { %v1762_v39 = vadd.f32 %v1761_v43, %v1760_v56 }
 0x248   :  { %v1711_v16 = vmul.f32 %v1703_v10, %v1670_v28 }
 0x249   :  { %v1764_v63 = vadd.f32 %v1763_v33, %v1762_v39 }
 0x24a   :  { %v1751_v27 = vmul.f32 %v1936_v14, %v1711_v16 }
 0x24c   :  { %v1765_v41 = vsel %vm1753_vm1, %v1751_v27, 0.0 }
 0x24d   :  { %v1766_v36 = vadd.f32 %v1765_v41, %v1764_v63 }
 0x24f   :  { %v1768_v62 = vadd.f32 %v1767_v61, %v1766_v36 }
 0x251   :  { %1769 = vadd.xlane.f32.xlu0 %v1768_v62 }
 0x2c4   :  { %v1770_v2 = vpop.xlane.xlu0 %1769 }
 0x2c5   :  { %v1771_v3 = vrot.slane %v1770_v2, 4 }
 0x2c7   :  { %v1772_v11 = vadd.f32 %v1771_v3, %v1770_v2 }
 0x2c9   :  { %v1773_v23 = vrot.slane %v1772_v11, 2 }
 0x2cb   :  { %v1774_v37 = vadd.f32 %v1773_v23, %v1772_v11 }
 0x2cd   :  { %v1775_v4 = vrot.slane %v1774_v37, 1 }
 0x2cf   :  { %v1776_v13 = vadd.f32 %v1775_v4, %v1774_v37 }
 0x2d1   :  { %1914 = vpush %v1776_v13 }
 0x302   :  { %s1915_s3 = spop %1914 }
 0x303   :  { %v1778_v47 = vstv %s1915_s3 }
 0x304   :  { %1779 = vst [vmem:[%s2575_s5] sm:$0xff] %v1778_v47 }
 0x305   :  { %1784 = vsyncpa [#allocation3], 1 }
 0x306   :  { %1785 = vsyncpa [#allocation7], 1 }
 0x307   :  { %1786 = vsyncpa [#allocation4], 1 }

</bundles_post_ra>
